<compile_context>
chip_gen: v5e
topology: v5e:2x2
jax: 0.10.0
libtpu: 0.0.40
codegen_flags: <defaults>
</compile_context>

<pallas_src>
import jax
import jax.numpy as jnp
from jax.experimental import pallas as pl
from jax.experimental.pallas import tpu as pltpu

_LANES = 512            # lane-dense width (multiple of 128) -> unmasked vst
_SMALL_ROWS = 64        # <=128 KiB f32: single un-gridded block
_TILE_BYTES = 4 << 20   # ~4 MiB per grid step (amortizes per-step overhead)
_MIN_GRID_STEPS = 4     # keep a few steps so the BlockSpec pipeline overlaps


def _hs_math(x):
    dt = x.dtype
    three = jnp.asarray(3, dt)
    zero = jnp.asarray(0, dt)
    six = jnp.asarray(6, dt)
    # relu6(x + 3) / 6 -- divide kept for bit-exactness vs the PyTorch ref.
    return jnp.minimum(jnp.maximum(x + three, zero), six) / six


def _h_sigmoid_kernel(x_ref, o_ref):
    o_ref[...] = _hs_math(x_ref[...]).astype(o_ref.dtype)


def _grid_semantics():
    # v7x has 2 TensorCores per chip: split the row-tile grid across them.
    # Single-TC chips (v5e / v6e) keep plain "parallel".
    try:
        kind = jax.devices()[0].device_kind.lower()
    except Exception:
        kind = ""
    if "v7" in kind or "tpu7" in kind:
        return (getattr(pltpu, "CORE_PARALLEL", "parallel"),)
    return ("parallel",)


def _h_sigmoid_2d(x2d):
    """Run the kernel on a lane-dense (rows, 512) view."""
    rows, lanes = x2d.shape
    dtype = x2d.dtype
    itemsize = jnp.dtype(dtype).itemsize
    cost = pl.CostEstimate(
        flops=4 * rows * lanes,
        transcendentals=0,
        bytes_accessed=2 * rows * lanes * itemsize,
    )

    if rows <= _SMALL_ROWS:
        # Tiny input: one block covering the whole array (block == full dims,
        # so the (8,128) rule is satisfied), no grid.
        return pl.pallas_call(
            _h_sigmoid_kernel,
            out_shape=jax.ShapeDtypeStruct((rows, lanes), dtype),
            in_specs=[pl.BlockSpec((rows, lanes), lambda: (0, 0))],
            out_specs=pl.BlockSpec((rows, lanes), lambda: (0, 0)),
            cost_estimate=cost,
        )(x2d)

    # Gridded, double-buffered path. Tile rows target ~4 MiB per DMA step
    # (scaled by itemsize so bf16 keeps the same bytes/step), shrunk for
    # mid-size inputs so there are at least ~_MIN_GRID_STEPS pipelined steps.
    max_rows = max(8, (_TILE_BYTES // (lanes * itemsize)) // 8 * 8)
    want_rows = ((pl.cdiv(rows, _MIN_GRID_STEPS) + 7) // 8) * 8
    tile_rows = min(max_rows, want_rows)
    # Non-dividing grid is fine: block (tile_rows, 512) is (8,128)-aligned and
    # the partial last block is masked (OOB reads unused-garbage, writes dropped).
    grid = (pl.cdiv(rows, tile_rows),)
    tile_bytes = tile_rows * lanes * itemsize
    vmem_limit = min(48 << 20, max(16 << 20, 4 * tile_bytes + (4 << 20)))

    return pl.pallas_call(
        _h_sigmoid_kernel,
        out_shape=jax.ShapeDtypeStruct((rows, lanes), dtype),
        grid=grid,
        in_specs=[pl.BlockSpec((tile_rows, lanes), lambda i: (i, 0))],
        out_specs=pl.BlockSpec((tile_rows, lanes), lambda i: (i, 0)),
        compiler_params=pltpu.CompilerParams(
            dimension_semantics=_grid_semantics(),
            vmem_limit_bytes=vmem_limit,
        ),
        cost_estimate=cost,
    )(x2d)


def h_sigmoid(x):
    """Elementwise hard-sigmoid: relu6(x + 3) / 6. Any shape (NCHW expected)."""
    orig_shape = x.shape
    n = x.size
    if n == 0:
        return x

    flat = x.reshape(-1)
    rem = n % _LANES

    if rem == 0:
        # Free reshape to a lane-dense 2D view; no padding, no slicing.
        out_flat = _h_sigmoid_2d(flat.reshape(n // _LANES, _LANES)).reshape(-1)
    elif n < _LANES:
        # Whole input smaller than one lane row: pad the (tiny) single row.
        padded = jnp.pad(flat, (0, _LANES - n))
        out_flat = _h_sigmoid_2d(padded.reshape(1, _LANES)).reshape(-1)[:n]
    else:
        # Bulk through the kernel; the <512-element lane remainder via plain
        # jnp (avoids whole-array pad + slice copies in HBM).
        n_bulk = n - rem
        bulk = _h_sigmoid_2d(
            flat[:n_bulk].reshape(n_bulk // _LANES, _LANES)).reshape(-1)
        tail = _hs_math(flat[n_bulk:])
        out_flat = jnp.concatenate([bulk, tail])

    return out_flat.reshape(orig_shape)


if __name__ == "__main__":
    k0, k1, k2 = jax.random.split(jax.random.PRNGKey(0), 3)

    def ref(v):
        return jnp.clip(v + 3.0, 0.0, 6.0) / 6.0

    # 1) Small NCHW input (single-block path), consistent with the module.
    x = jax.random.normal(k0, (2, 4, 16, 16), dtype=jnp.float32) * 4.0
    y = jax.block_until_ready(h_sigmoid(x))
    assert y.shape == x.shape
    assert jnp.allclose(y, ref(x), atol=1e-6), "mismatch (small)"

    # 2) Mid-size input exercising the gridded path incl. a masked partial
    #    last block (80 rows of 512 lanes, 24-row tiles -> 4 steps).
    x_mid = jax.random.normal(k1, (1, 10, 64, 64), dtype=jnp.float32) * 4.0
    y_mid = jax.block_until_ready(h_sigmoid(x_mid))
    assert y_mid.shape == x_mid.shape
    assert jnp.allclose(y_mid, ref(x_mid), atol=1e-6), "mismatch (grid)"

    # 3) Lane-remainder input (n % 512 != 0): bulk kernel + jnp tail.
    x_odd = jax.random.normal(k2, (2, 3, 15, 15), dtype=jnp.float32) * 4.0
    y_odd = jax.block_until_ready(h_sigmoid(x_odd))
    assert y_odd.shape == x_odd.shape
    assert jnp.allclose(y_odd, ref(x_odd), atol=1e-6), "mismatch (remainder)"

    print("KERNEL_OK")
</pallas_src>

<mosaic_0001>
module attributes {stable_mosaic.version = 11 : i64} {
  func.func @_h_sigmoid_kernel(%arg0: memref<4x512xf32, #tpu.memory_space<vmem>>, %arg1: memref<4x512xf32, #tpu.memory_space<vmem>>) attributes {dimension_semantics = [], scalar_prefetch = 0 : i64, scratch_operands = 0 : i64, tpu.core_type = #tpu.core_type<tc>} {
    %c0 = arith.constant 0 : index
    %c0_0 = arith.constant 0 : index
    %0 = vector.load %arg0[%c0, %c0_0] : memref<4x512xf32, #tpu.memory_space<vmem>>, vector<4x512xf32>
    %cst = arith.constant 3.000000e+00 : f32
    %1 = vector.broadcast %cst : f32 to vector<4x512xf32>
    %2 = arith.addf %0, %1 : vector<4x512xf32>
    %cst_1 = arith.constant 0.000000e+00 : f32
    %3 = vector.broadcast %cst_1 : f32 to vector<4x512xf32>
    %4 = arith.maximumf %2, %3 : vector<4x512xf32>
    %cst_2 = arith.constant 6.000000e+00 : f32
    %5 = vector.broadcast %cst_2 : f32 to vector<4x512xf32>
    %6 = arith.minimumf %4, %5 : vector<4x512xf32>
    %cst_3 = arith.constant 6.000000e+00 : f32
    %7 = vector.broadcast %cst_3 : f32 to vector<4x512xf32>
    %8 = arith.divf %6, %7 : vector<4x512xf32>
    %c0_4 = arith.constant 0 : index
    %c0_5 = arith.constant 0 : index
    %9 = vector.load %arg1[%c0_4, %c0_5] : memref<4x512xf32, #tpu.memory_space<vmem>>, vector<4x512xf32>
    tpu.vector_store %arg1[%c0_4, %c0_5], %8 {strides = array<i32>} : memref<4x512xf32, #tpu.memory_space<vmem>>, vector<4x512xf32>,
    return
  }
}

</mosaic_0001>

<bundles_post_ra>
// kernel: tpu_custom_call.1
= control target key start
LH: loop header
LB: loop body
LE: loop exit
PB: predicated region body
PF: predicated region fallthrough
CT: control target
= control target key end

     0   :  { %6 = vsyncpa [#allocation3], 0  ;;  %s135_s0 = inlined_call_operand.hbm [shape: f32[4,512], index: 0, kind: input, shape index: {}]   ;;  %s136_s1 = inlined_call_operand.hbm [shape: f32[4,512], index: 1, kind: output, shape index: {}]  }
   0x1   :  { %7 = vsyncpa [#allocation4], 0  ;;  %s13_s8 = sshll.u32 %s135_s0, 4  ;;  %s116_s9 = smov [#allocation2]   ;;  %s14_s8 = int_to_ptr.hbm [resolvable:$true] %s13_s8 }
   0x2   :  { %s15_s10 = sshll.u32 %s116_s9, 4  ;;  %s16_s10 = int_to_ptr.vmem [resolvable:$true] %s15_s10 }
   0x3   :  { %18 = dma.hbm_to_vmem [thread:$0]  %s14_s8, 256, %s16_s10, [#allocation3]  }
   0x4   :  { %112 = dma.done.wait [#allocation3], 256  }
   0x5   :  { %113 = vsyncadd [#allocation3], 4294967040  ;;  %v117_v0 = vmov 6.0   ;;  %v23_v2 = vld [vmem:[#allocation2] sm:$0xff]  ;;  %v24_v3 = vld [vmem:[#allocation2 + $0x8] sm:$0xff]  ;;  %s118_s0 = smov [#allocation5]  }
   0x6   :  { %62 = vrcp.f32 %v117_v0  ;;  %v25_v4 = vadd.f32 3.0, %v23_v2  ;;  %v26_v6 = vadd.f32 3.0, %v24_v3  ;;  %s47_s11 = sshll.u32 %s118_s0, 4  ;;  %s49_s14 = sshll.u32 %s136_s1, 4  ;;  %s48_s11 = int_to_ptr.vmem [resolvable:$true] %s47_s11  ;;  %s50_s14 = int_to_ptr.hbm [resolvable:$true] %s49_s14 }
   0x8   :  { %v27_v7 = vmax.f32 %v25_v4, 0.0  ;;  %v28_v9 = vmax.f32 %v26_v6, 0.0 }
   0xa   :  { %v29_v11 = vmin.f32 %v27_v7, 6.0  ;;  %v30_v12 = vmin.f32 %v28_v9, 6.0 }
   0xc   :  { %v63_v1 = vpop.eup %62 }
   0xd   :  { %v32_v5 = vmul.f32 6.0, %v63_v1  ;;  %vm36_vm0 = vweird.f32 %v63_v1 }
   0xf   :  { %v33_v8 = vsub.f32 1.0, %v32_v5 }
  0x11   :  { %v34_v10 = vmul.f32 %v63_v1, %v33_v8 }
  0x13   :  { %v35_v13 = vadd.f32 %v63_v1, %v34_v10 }
  0x15   :  { %v37_v14 = vsel %vm36_vm0, %v63_v1, %v35_v13 }
  0x16   :  { %v38_v15 = vmul.f32 %v37_v14, %v29_v11  ;;  %v39_v16 = vmul.f32 %v37_v14, %v30_v12 }
  0x18   :  { %40 = vst [vmem:[#allocation5] sm:$0xff] %v38_v15 }
  0x19   :  { %41 = vst [vmem:[#allocation5 + $0x8] sm:$0xff] %v39_v16 }
  0x1a   :  { %52 = dma.vmem_to_hbm [thread:$0]  %s48_s11, 256, %s50_s14, [#allocation4]  }
  0x1b   :  { %114 = dma.done.wait [#allocation4], 256  }
  0x1c   :  { %115 = vsyncadd [#allocation4], 4294967040 }
  0x1d   :  { %57 = vsyncpa [#allocation3], 1 }
  0x1e   :  { %58 = vsyncpa [#allocation4], 1 }

</bundles_post_ra>
